<compile_context>
chip_gen: v5e
topology: v5e:2x2
jax: 0.10.0
libtpu: 0.0.40
codegen_flags: <defaults>
</compile_context>

<pallas_src>
import functools

import jax
import jax.numpy as jnp
from jax.experimental import pallas as pl
from jax.experimental.pallas import tpu as pltpu


# ---------------------------------------------------------------------------
# Init-time weight fusion (hoisted out of the forward path).
# Chunk-interleaved [w1_chunk | w3_chunk] per th-sized H chunk.
# ---------------------------------------------------------------------------
def fuse_expert_weights(w1, w3, th):
    E, D, H = w1.shape
    assert H % th == 0
    nh = H // th
    return jnp.concatenate(
        [w1.reshape(E, D, nh, th), w3.reshape(E, D, nh, th)], axis=3
    ).reshape(E, D, 2 * H)


# ---------------------------------------------------------------------------
# Pallas kernel: grouped expert FFN.
#   grid = (num_row_tiles, num_h_chunks); each row tile belongs to exactly one
#   expert (scalar-prefetched tile_expert); the H axis is the innermost
#   reduction axis accumulating into a f32 VMEM scratch.  Fully-padded
#   ("zombie") tiles skip the MXU work via the scalar-prefetched valid flag.
# ---------------------------------------------------------------------------
def _moe_gmm_kernel(eid_ref, valid_ref, x_ref, w13_ref, w2_ref, rw_ref,
                    o_ref, acc_ref, *, th):
    t = pl.program_id(0)
    h = pl.program_id(1)

    @pl.when(h == 0)
    def _():
        acc_ref[...] = jnp.zeros_like(acc_ref)

    @pl.when(valid_ref[t] != 0)
    def _():
        x = x_ref[...]                                                # (tm, D) native dtype
        # Fused (w1 | w3) chunk: one (tm, D) @ (D, 2*th) MXU pass, f32 acc.
        h13 = jnp.dot(x, w13_ref[0], preferred_element_type=jnp.float32)
        h1 = h13[:, :th]
        h3 = h13[:, th:]
        act = (h1 * jax.nn.sigmoid(h1)) * h3                          # SwiGLU in f32
        # Partial second matmul over this H chunk; act cast back to the weight
        # dtype (bf16 in production) so the MXU runs at bf16 rate.
        acc_ref[...] += jnp.dot(act.astype(w2_ref.dtype), w2_ref[0],
                                preferred_element_type=jnp.float32)   # (tm, D)

    @pl.when(h == pl.num_programs(1) - 1)
    def _():
        # Routing weight folded into the epilogue (f32, before the cast).
        o_ref[...] = (acc_ref[...] * rw_ref[...]).astype(o_ref.dtype)


def moe_gmm(x_rows, w13, w2, row_weight, tile_expert, tile_valid, *, tm, th,
            vmem_limit_bytes=None):
    """x_rows: (R_pad, D) expert-sorted rows; w13: (E, D, 2H) pre-fused;
    w2: (E, H, D); row_weight: (R_pad, 1) f32; tile_expert/tile_valid:
    (R_pad//tm,) int32 scalar-prefetch arrays."""
    R, D = x_rows.shape
    E, H, _ = w2.shape
    assert R % tm == 0 and H % th == 0
    nh = H // th
    grid = (R // tm, nh)

    def x_map(t, h, eids, valid):
        return (t, 0)

    def rw_map(t, h, eids, valid):
        return (t, 0)

    def o_map(t, h, eids, valid):
        return (t, 0)

    # Serpentine H traversal: odd row tiles walk the chunks in reverse so the
    # boundary weight chunk's block index repeats across consecutive tiles of
    # the same expert and Pallas elides the re-DMA.
    def w13_map(t, h, eids, valid):
        hh = h + (t % 2) * (nh - 1 - 2 * h)
        return (eids[t], 0, hh)

    def w2_map(t, h, eids, valid):
        hh = h + (t % 2) * (nh - 1 - 2 * h)
        return (eids[t], hh, 0)

    kernel = functools.partial(_moe_gmm_kernel, th=th)
    return pl.pallas_call(
        kernel,
        out_shape=jax.ShapeDtypeStruct((R, D), x_rows.dtype),
        grid_spec=pltpu.PrefetchScalarGridSpec(
            num_scalar_prefetch=2,
            grid=grid,
            in_specs=[
                # token rows: index independent of h -> resident across H chunks
                pl.BlockSpec((tm, D), x_map),
                # fused [w1|w3] chunk of the expert that owns this row tile
                pl.BlockSpec((1, D, 2 * th), w13_map),
                # matching w2 chunk
                pl.BlockSpec((1, th, D), w2_map),
                # per-row routing weight, resident across H chunks
                pl.BlockSpec((tm, 1), rw_map),
            ],
            out_specs=pl.BlockSpec((tm, D), o_map),
            scratch_shapes=[pltpu.VMEM((tm, D), jnp.float32)],
        ),
        compiler_params=pltpu.CompilerParams(
            dimension_semantics=("parallel", "arbitrary"),
            vmem_limit_bytes=vmem_limit_bytes,
        ),
    )(tile_expert, tile_valid, x_rows, w13, w2, row_weight)


# ---------------------------------------------------------------------------
# Routing glue: sort (token, slot) pairs by expert, pad each expert group to a
# multiple of tm, compute per-tile expert ids / valid flags and the inverse
# permutation used by the gather-based combine.  Fully static shapes.
# ---------------------------------------------------------------------------
def _route_and_pack(topk_idx, topk_w, T, E, k, tm):
    R = T * k
    flat_e = topk_idx.reshape(-1).astype(jnp.int32)               # (R,)
    flat_t = jnp.repeat(jnp.arange(T, dtype=jnp.int32), k)        # (R,)
    flat_w = topk_w.reshape(-1).astype(jnp.float32)               # (R,)

    order = jnp.argsort(flat_e)                                   # stable: group by expert
    se = flat_e[order]
    st = flat_t[order]
    sw = flat_w[order]

    group_sizes = jnp.bincount(flat_e, length=E).astype(jnp.int32)            # (E,)
    group_starts = jnp.concatenate(
        [jnp.zeros((1,), jnp.int32), jnp.cumsum(group_sizes)[:-1].astype(jnp.int32)])
    padded_sizes = ((group_sizes + tm - 1) // tm) * tm
    padded_starts = jnp.concatenate(
        [jnp.zeros((1,), jnp.int32), jnp.cumsum(padded_sizes)[:-1].astype(jnp.int32)])
    padded_ends = jnp.cumsum(padded_sizes).astype(jnp.int32)

    rank = jnp.arange(R, dtype=jnp.int32) - group_starts[se]      # rank within group
    dest = padded_starts[se] + rank                               # unique destinations

    # Static upper bound on padded rows, rounded to full tiles.
    R_pad = ((R + E * (tm - 1)) + tm - 1) // tm * tm
    row_token = jnp.zeros((R_pad,), jnp.int32).at[dest].set(st)
    row_weight = jnp.zeros((R_pad,), jnp.float32).at[dest].set(sw)

    # Inverse permutation: padded destination of flat pair r = token*k + slot.
    inv_order = jnp.argsort(order)
    dest_flat = dest[inv_order]                                   # (R,)

    num_tiles = R_pad // tm
    tile_start = jnp.arange(num_tiles, dtype=jnp.int32) * tm
    total_padded = padded_ends[-1]
    tile_valid = (tile_start < total_padded).astype(jnp.int32)
    te_raw = jnp.minimum(
        jnp.searchsorted(padded_ends, tile_start, side="right"), E - 1
    ).astype(jnp.int32)
    # Zombie tiles repeat the last valid tile's expert -> weight DMA elided.
    num_valid = jnp.maximum(total_padded // tm, 1)
    last_valid_expert = te_raw[num_valid - 1]
    tile_expert = jnp.where(tile_valid == 1, te_raw, last_valid_expert).astype(jnp.int32)
    return row_token, row_weight, tile_expert, tile_valid, dest_flat


# ---------------------------------------------------------------------------
# Full MoE forward: gate + top-k routing + grouped Pallas FFN + gather combine.
# `w13` is the pre-fused weight from fuse_expert_weights (init-time).
# ---------------------------------------------------------------------------
def moe_layer(x, gate_w, w13, w2, num_experts_per_tok, *, tm, th,
              vmem_limit_bytes=None):
    T, D = x.shape
    E, H, _ = w2.shape
    k = num_experts_per_tok
    assert H % th == 0
    assert tm % 8 == 0
    if x.dtype == jnp.bfloat16:
        assert tm % 16 == 0, "bf16 row tiles must be a multiple of 16"

    # gate(inputs), topk, softmax (tiny; plain JAX glue). Weights kept in f32.
    gate_logits = jnp.dot(x, gate_w)                               # (T, E)
    topk_vals, topk_idx = jax.lax.top_k(gate_logits, k)            # (T, k)
    topk_w = jax.nn.softmax(topk_vals.astype(jnp.float32), axis=1)

    row_token, row_weight, tile_expert, tile_valid, dest_flat = _route_and_pack(
        topk_idx, topk_w, T, E, k, tm)

    # TODO(synk): fuse this gather into the kernel with a pl.Element row gather
    # driven by a scalar-prefetched row_token to avoid materializing the
    # k-duplicated activations (R_pad, D) in HBM.
    x_rows = jnp.take(x, row_token, axis=0)                        # (R_pad, D)

    out_rows = moe_gmm(x_rows, w13, w2, row_weight[:, None], tile_expert,
                       tile_valid, tm=tm, th=th,
                       vmem_limit_bytes=vmem_limit_bytes)          # (R_pad, D) weighted

    # Inverse-permutation gather + sum over k (no scatter-add; pad rows never read).
    expert_out = jnp.take(out_rows, dest_flat, axis=0).reshape(T, k, D)
    out = jnp.sum(expert_out.astype(jnp.float32), axis=1)
    return out.astype(x.dtype)


# ---------------------------------------------------------------------------
# Pure-JAX reference replicating the PyTorch loop semantics.
# ---------------------------------------------------------------------------
def moe_reference(x, gate_w, w1, w3, w2, num_experts_per_tok):
    E = gate_w.shape[1]
    k = num_experts_per_tok
    gate_logits = x @ gate_w
    topk_vals, topk_idx = jax.lax.top_k(gate_logits, k)
    topk_w = jax.nn.softmax(topk_vals.astype(jnp.float32), axis=1).astype(x.dtype)

    results = jnp.zeros_like(x)
    for e in range(E):
        mask = (topk_idx == e)                                      # (T, k)
        w_e = jnp.sum(jnp.where(mask, topk_w, 0.0), axis=1, keepdims=True)
        h = jax.nn.silu(x @ w1[e]) * (x @ w3[e])
        results = results + w_e * (h @ w2[e])
    return results


if __name__ == "__main__":
    # Small, deterministic shapes.
    T, D, H = 16, 32, 64           # tokens, model dim, FFN hidden dim
    E, K = 4, 2                    # num_experts, num_experts_per_tok

    key = jax.random.PRNGKey(0)
    kx, kg, k1, k2, k3 = jax.random.split(key, 5)

    x = jax.random.normal(kx, (T, D), dtype=jnp.float32)
    gate_w = jax.random.normal(kg, (D, E), dtype=jnp.float32) * 0.1
    w1 = jax.random.normal(k1, (E, D, H), dtype=jnp.float32) * 0.1
    w3 = jax.random.normal(k3, (E, D, H), dtype=jnp.float32) * 0.1
    w2 = jax.random.normal(k2, (E, H, D), dtype=jnp.float32) * 0.1

    # Toy tiles for the self-test; production values per the header comment.
    tm, th = 8, H
    w13 = fuse_expert_weights(w1, w3, th)      # init-time fusion (hoisted)

    out = moe_layer(x, gate_w, w13, w2, K, tm=tm, th=th)
    out = jax.block_until_ready(out)

    ref = moe_reference(x, gate_w, w1, w3, w2, K)
    assert out.shape == x.shape and out.dtype == x.dtype
    assert jnp.allclose(out, ref, atol=1e-4, rtol=1e-4), "mismatch vs reference"

    print("KERNEL_OK")
</pallas_src>

<mosaic_0001>
module attributes {stable_mosaic.version = 11 : i64} {
  func.func @_moe_gmm_kernel(%arg0: i32, %arg1: i32, %arg2: memref<8xi32, #tpu.memory_space<smem>>, %arg3: memref<8xi32, #tpu.memory_space<smem>>, %arg4: memref<8x32xf32, #tpu.memory_space<vmem>>, %arg5: memref<1x32x128xf32, #tpu.memory_space<vmem>>, %arg6: memref<1x64x32xf32, #tpu.memory_space<vmem>>, %arg7: memref<8x1xf32, #tpu.memory_space<vmem>>, %arg8: memref<8x32xf32, #tpu.memory_space<vmem>>, %arg9: memref<8x32xf32, #tpu.memory_space<vmem>>) attributes {dimension_semantics = [#tpu.dimension_semantics<parallel>, #tpu.dimension_semantics<arbitrary>], iteration_bounds = array<i64: 8, 1>, scalar_prefetch = 2 : i64, scratch_operands = 1 : i64, tpu.core_type = #tpu.core_type<tc>, window_params = [{transform_indices = @transform_0, window_bounds = array<i64: 8, 32>}, {transform_indices = @transform_1, window_bounds = array<i64: 1, 32, 128>}, {transform_indices = @transform_2, window_bounds = array<i64: 1, 64, 32>}, {transform_indices = @transform_3, window_bounds = array<i64: 8, 1>}, {transform_indices = @transform_4, window_bounds = array<i64: 8, 32>}]} {
    %c0_i32 = arith.constant 0 : i32
    %0 = arith.cmpi eq, %arg1, %c0_i32 : i32
    %1 = arith.extui %0 : i1 to i32
    %c0_i32_0 = arith.constant 0 : i32
    %2 = arith.cmpi ne, %1, %c0_i32_0 : i32
    scf.if %2 {
      %cst = arith.constant 0.000000e+00 : f32
      %11 = vector.broadcast %cst : f32 to vector<8x32xf32>
      %c0 = arith.constant 0 : index
      %c0_5 = arith.constant 0 : index
      %12 = vector.load %arg9[%c0, %c0_5] : memref<8x32xf32, #tpu.memory_space<vmem>>, vector<8x32xf32>
      tpu.vector_store %arg9[%c0, %c0_5], %11 {strides = array<i32>} : memref<8x32xf32, #tpu.memory_space<vmem>>, vector<8x32xf32>,
    } else {
    }
    %3 = arith.index_cast %arg0 : i32 to index
    %4 = memref.load %arg3[%3] : memref<8xi32, #tpu.memory_space<smem>>
    %c0_i32_1 = arith.constant 0 : i32
    %5 = arith.cmpi ne, %4, %c0_i32_1 : i32
    %6 = arith.extui %5 : i1 to i32
    %c0_i32_2 = arith.constant 0 : i32
    %7 = arith.cmpi ne, %6, %c0_i32_2 : i32
    scf.if %7 {
      %c0 = arith.constant 0 : index
      %c0_5 = arith.constant 0 : index
      %11 = vector.load %arg4[%c0, %c0_5] : memref<8x32xf32, #tpu.memory_space<vmem>>, vector<8x32xf32>
      %c0_6 = arith.constant 0 : index
      %c0_7 = arith.constant 0 : index
      %c0_8 = arith.constant 0 : index
      %12 = vector.load %arg5[%c0_6, %c0_7, %c0_8] : memref<1x32x128xf32, #tpu.memory_space<vmem>>, vector<1x32x128xf32>
      %13 = vector.shape_cast %12 : vector<1x32x128xf32> to vector<32x128xf32>
      %cst = arith.constant dense<0.000000e+00> : vector<8x128xf32>
      %14 = tpu.matmul %11, %13, %cst {dimension_numbers = #tpu.dot_dimension_numbers<[1], [0], [0], [1], [0, 0, 1, 1], [], []>} : vector<8x32xf32>, vector<32x128xf32>, vector<8x128xf32> -> vector<8x128xf32>
      %15 = vector.extract_strided_slice %14 {offsets = [0, 0], sizes = [8, 64], strides = [1, 1]} : vector<8x128xf32> to vector<8x64xf32>
      %16 = vector.extract_strided_slice %14 {offsets = [0, 64], sizes = [8, 64], strides = [1, 1]} : vector<8x128xf32> to vector<8x64xf32>
      %17 = arith.negf %15 : vector<8x64xf32>
      %18 = math.exp %17 : vector<8x64xf32>
      %cst_9 = arith.constant 1.000000e+00 : f32
      %19 = vector.broadcast %cst_9 : f32 to vector<8x64xf32>
      %20 = arith.addf %19, %18 : vector<8x64xf32>
      %21 = arith.divf %19, %20 : vector<8x64xf32>
      %22 = arith.mulf %15, %21 : vector<8x64xf32>
      %23 = arith.mulf %22, %16 : vector<8x64xf32>
      %c0_10 = arith.constant 0 : index
      %c0_11 = arith.constant 0 : index
      %24 = vector.load %arg9[%c0_10, %c0_11] : memref<8x32xf32, #tpu.memory_space<vmem>>, vector<8x32xf32>
      %c0_12 = arith.constant 0 : index
      %c0_13 = arith.constant 0 : index
      %c0_14 = arith.constant 0 : index
      %25 = vector.load %arg6[%c0_12, %c0_13, %c0_14] : memref<1x64x32xf32, #tpu.memory_space<vmem>>, vector<1x64x32xf32>
      %26 = vector.shape_cast %25 : vector<1x64x32xf32> to vector<64x32xf32>
      %cst_15 = arith.constant dense<0.000000e+00> : vector<8x32xf32>
      %27 = tpu.matmul %23, %26, %cst_15 {dimension_numbers = #tpu.dot_dimension_numbers<[1], [0], [0], [1], [0, 0, 1, 1], [], []>} : vector<8x64xf32>, vector<64x32xf32>, vector<8x32xf32> -> vector<8x32xf32>
      %28 = arith.addf %24, %27 : vector<8x32xf32>
      %c0_16 = arith.constant 0 : index
      %c0_17 = arith.constant 0 : index
      %29 = vector.load %arg9[%c0_16, %c0_17] : memref<8x32xf32, #tpu.memory_space<vmem>>, vector<8x32xf32>
      tpu.vector_store %arg9[%c0_16, %c0_17], %28 {strides = array<i32>} : memref<8x32xf32, #tpu.memory_space<vmem>>, vector<8x32xf32>,
    } else {
    }
    %c0_i32_3 = arith.constant 0 : i32
    %8 = arith.cmpi eq, %arg1, %c0_i32_3 : i32
    %9 = arith.extui %8 : i1 to i32
    %c0_i32_4 = arith.constant 0 : i32
    %10 = arith.cmpi ne, %9, %c0_i32_4 : i32
    scf.if %10 {
      %c0 = arith.constant 0 : index
      %c0_5 = arith.constant 0 : index
      %11 = vector.load %arg9[%c0, %c0_5] : memref<8x32xf32, #tpu.memory_space<vmem>>, vector<8x32xf32>
      %c0_6 = arith.constant 0 : index
      %c0_7 = arith.constant 0 : index
      %12 = vector.load %arg7[%c0_6, %c0_7] : memref<8x1xf32, #tpu.memory_space<vmem>>, vector<8x1xf32>
      %13 = vector.broadcast %12 : vector<8x1xf32> to vector<8x32xf32>
      %14 = arith.mulf %11, %13 : vector<8x32xf32>
      %c0_8 = arith.constant 0 : index
      %c0_9 = arith.constant 0 : index
      %15 = vector.load %arg8[%c0_8, %c0_9] : memref<8x32xf32, #tpu.memory_space<vmem>>, vector<8x32xf32>
      tpu.vector_store %arg8[%c0_8, %c0_9], %14 {strides = array<i32>} : memref<8x32xf32, #tpu.memory_space<vmem>>, vector<8x32xf32>,
    } else {
    }
    return
  }
  func.func @transform_0(%arg0: i32, %arg1: i32, %arg2: memref<8xi32, #tpu.memory_space<smem>>, %arg3: memref<8xi32, #tpu.memory_space<smem>>) -> (i32, i32) {
    %c0_i32 = arith.constant 0 : i32
    %c0_i32_0 = arith.constant 0 : i32
    return %arg0, %c0_i32 : i32, i32
  }
  func.func @transform_1(%arg0: i32, %arg1: i32, %arg2: memref<8xi32, #tpu.memory_space<smem>>, %arg3: memref<8xi32, #tpu.memory_space<smem>>) -> (i32, i32, i32) {
    %c2_i32 = arith.constant 2 : i32
    %c0_i32 = arith.constant 0 : i32
    %0 = arith.cmpi eq, %c2_i32, %c0_i32 : i32
    %c1_i32 = arith.constant 1 : i32
    %1 = arith.select %0, %c1_i32, %c2_i32 : i32
    %2 = arith.remsi %arg0, %1 : i32
    %c0_i32_0 = arith.constant 0 : i32
    %3 = arith.cmpi ne, %2, %c0_i32_0 : i32
    %c0_i32_1 = arith.constant 0 : i32
    %4 = arith.cmpi slt, %2, %c0_i32_1 : i32
    %c0_i32_2 = arith.constant 0 : i32
    %5 = arith.cmpi slt, %1, %c0_i32_2 : i32
    %6 = arith.xori %4, %5 : i1
    %7 = arith.andi %6, %3 : i1
    %8 = arith.addi %2, %1 : i32
    %9 = arith.select %7, %8, %2 : i32
    %c2_i32_3 = arith.constant 2 : i32
    %10 = arith.muli %c2_i32_3, %arg1 : i32
    %c0_i32_4 = arith.constant 0 : i32
    %11 = arith.subi %c0_i32_4, %10 : i32
    %12 = arith.muli %9, %11 : i32
    %13 = arith.addi %arg1, %12 : i32
    %14 = arith.index_cast %arg0 : i32 to index
    %15 = memref.load %arg2[%14] : memref<8xi32, #tpu.memory_space<smem>>
    %c0_i32_5 = arith.constant 0 : i32
    %c0_i32_6 = arith.constant 0 : i32
    return %15, %c0_i32_5, %13 : i32, i32, i32
  }
  func.func @transform_2(%arg0: i32, %arg1: i32, %arg2: memref<8xi32, #tpu.memory_space<smem>>, %arg3: memref<8xi32, #tpu.memory_space<smem>>) -> (i32, i32, i32) {
    %c2_i32 = arith.constant 2 : i32
    %c0_i32 = arith.constant 0 : i32
    %0 = arith.cmpi eq, %c2_i32, %c0_i32 : i32
    %c1_i32 = arith.constant 1 : i32
    %1 = arith.select %0, %c1_i32, %c2_i32 : i32
    %2 = arith.remsi %arg0, %1 : i32
    %c0_i32_0 = arith.constant 0 : i32
    %3 = arith.cmpi ne, %2, %c0_i32_0 : i32
    %c0_i32_1 = arith.constant 0 : i32
    %4 = arith.cmpi slt, %2, %c0_i32_1 : i32
    %c0_i32_2 = arith.constant 0 : i32
    %5 = arith.cmpi slt, %1, %c0_i32_2 : i32
    %6 = arith.xori %4, %5 : i1
    %7 = arith.andi %6, %3 : i1
    %8 = arith.addi %2, %1 : i32
    %9 = arith.select %7, %8, %2 : i32
    %c2_i32_3 = arith.constant 2 : i32
    %10 = arith.muli %c2_i32_3, %arg1 : i32
    %c0_i32_4 = arith.constant 0 : i32
    %11 = arith.subi %c0_i32_4, %10 : i32
    %12 = arith.muli %9, %11 : i32
    %13 = arith.addi %arg1, %12 : i32
    %14 = arith.index_cast %arg0 : i32 to index
    %15 = memref.load %arg2[%14] : memref<8xi32, #tpu.memory_space<smem>>
    %c0_i32_5 = arith.constant 0 : i32
    %c0_i32_6 = arith.constant 0 : i32
    return %15, %13, %c0_i32_5 : i32, i32, i32
  }
  func.func @transform_3(%arg0: i32, %arg1: i32, %arg2: memref<8xi32, #tpu.memory_space<smem>>, %arg3: memref<8xi32, #tpu.memory_space<smem>>) -> (i32, i32) {
    %c0_i32 = arith.constant 0 : i32
    %c0_i32_0 = arith.constant 0 : i32
    return %arg0, %c0_i32 : i32, i32
  }
  func.func @transform_4(%arg0: i32, %arg1: i32, %arg2: memref<8xi32, #tpu.memory_space<smem>>, %arg3: memref<8xi32, #tpu.memory_space<smem>>) -> (i32, i32) {
    %c0_i32 = arith.constant 0 : i32
    %c0_i32_0 = arith.constant 0 : i32
    return %arg0, %c0_i32 : i32, i32
  }
}

</mosaic_0001>

<bundles_post_ra>
// kernel: tpu_custom_call.1
= control target key start
LH: loop header
LB: loop body
LE: loop exit
PB: predicated region body
PF: predicated region fallthrough
CT: control target
= control target key end

     0   :  { %s886_s27 = smov [#allocation4]   ;;  %s887_s28 = smov [#allocation5]   ;;  %s1003_s0 = inlined_call_operand.vmem [shape: s32[8], index: 0, kind: input, shape index: {}]   ;;  %s1004_s2 = inlined_call_operand.vmem [shape: f32[64,32], index: 2, kind: input, shape index: {}]   ;;  %s1005_s3 = inlined_call_operand.vmem [shape: f32[4,32,128], index: 3, kind: input, shape index: {}]   ;;  %s1006_s4 = inlined_call_operand.vmem [shape: f32[4,64,32], index: 4, kind: input, shape index: {}]   ;;  %s1007_s5 = inlined_call_operand.vmem [shape: f32[64,1], index: 5, kind: input, shape index: {}]   ;;  %s1008_s6 = inlined_call_operand.vmem [shape: f32[64,32], index: 6, kind: output, shape index: {}]   ;;  %s1009_s1 = inlined_call_operand.vmem [shape: s32[8], index: 1, kind: input, shape index: {}]  }
   0x1   :  { %s12_s23 = sshll.u32 %s1003_s0, 4  ;;  %s17_s26 = sshll.u32 %s1009_s1, 4  ;;  %s13_s23 = int_to_ptr.vmem [resolvable:$true] %s12_s23  ;;  %s18_s26 = int_to_ptr.vmem [resolvable:$true] %s17_s26 }
   0x2   :  { %15 = dma.vmem_to_smem %s13_s23, 16, %s886_s27, [#allocation3] }
   0x3   :  { %20 = dma.vmem_to_smem %s18_s26, 16, %s887_s28, [#allocation3] }
   0x4   :  { %872 = dma.done.wait [#allocation3], 32 }
   0x5   :  { %873 = vsyncadd [#allocation3], 4294967264 }
   0x6   :  { %23 = sfence }
   0x7   :  { %s932_s29 = smov 0   ;;  %s934_s30 = smov 0  }
   0x8   :  { %s936_s7 = smov 0  }
   0x9 LB: > { %s41_s0 = sadd.s32 1, %s880_s30  ;;  %p780_p0 = scmp.ge.s32.totalorder %s884_s7, 1  ;;  %s884_s7 = sphi %s936_s7, %s29_s7   ;;  %s880_s30 = sphi %s934_s30, %s1011_s30   ;;  %s876_s29 = sphi %s932_s29, %s1010_s29  }
   0xa   : > { %p43_p1 = scmp.ge.s32.totalorder %s41_s0, 8  ;;  %p365_p2 = scmp.lt.s32.totalorder %s884_s7, 9 }
   0xc   : > { %s1013_s0 = smov (%p43_p1, %s41_s0), 0  ;;  %p366_p3 = pnand %p780_p0, %p365_p2 }
   0xd   : > { %p444_p4 = scmp.lt.s32.totalorder (!%p366_p3), %s876_s29, 7  ;;  %s464_s1 = sld [smem:[#allocation4 + %s876_s29]] (!%p366_p3) }
   0xe   : > { %369 = sbr.rel (%p366_p3) target bundleno = 531 (0x213), region = 36  ;;  %s506_s8 = sld [smem:[#allocation4 + %s876_s29]] (!%p366_p3) }
   0xf   : > { %s548_s10 = sld [smem:[#allocation5 + %s876_s29]] (!%p366_p3) }
  0x13   : > { %vm546_vm0 = vcmask 261120   ;;  %v888_v0 = vmov 0.0   ;;  %s445_s9 = scalar_select %p444_p4, %s876_s29, 7 }
  0x14   : > { %547 = vst.msk [vmem:[#allocation2] sm:$0xff] %vm546_vm0, %v888_v0  ;;  %p465_p5 = scmp.lt.s32.totalorder %s464_s1, 3  ;;  %p508_p6 = scmp.lt.s32.totalorder %s506_s8, 3 }
  0x15   : > { %s951_s11 = sshll.u32 %s445_s9, 3  ;;  %p794_p7 = scmp.eq.s32.totalorder %s548_s10, 0 }
  0x16   : > { %s447_s14 = scalar_lea.vmem %s1004_s2, %s951_s11  ;;  %s537_s17 = scalar_lea.vmem %s1007_s5, %s951_s11 }
  0x17   : > { %s541_s20 = scalar_lea.vmem %s1008_s6, %s951_s11  ;;  %s1015_s1 = smov (!%p465_p5, %s464_s1), 3 }
  0x18   : > { %s1017_s8 = smov (!%p508_p6, %s506_s8), 3  ;;  %s800_s21 = sshll.u32 %s1015_s1, 5 }
  0x19   : > { %s472_s24 = scalar_lea.vmem %s1005_s3, %s800_s21  ;;  %s801_s25 = sshll.u32 %s1017_s8, 6 }
  0x1a   : > { %s971_s28 = scalar_lea.vmem %s1006_s4, %s801_s25  ;;  %552 = sbr.rel (%p794_p7) target bundleno = 411 (0x19b), region = 44 }
  0x1b   : > { %s889_s29 = smov (!%p794_p7), 64  }
  0x1f   : > { %v557_v1 = vld [vmem:[%s472_s24 + $0x18] sm:$0xff]  ;;  %v556_v2 = vld [vmem:[%s472_s24 + $0x10] sm:$0xff]  ;;  %v555_v3 = vld [vmem:[%s472_s24 + $0x8] sm:$0xff]  ;;  %vm616_vm5 = vcmask 523264  }
  0x20   : > { %574 = vmatpush.msra.mxu0 %v557_v1  ;;  %v554_v4 = vld [vmem:[%s472_s24] sm:$0xff]  ;;  %v615_v6 = vld [vmem:[%s971_s28 + $0x38] sm:$0xff]  ;;  %v614_v7 = vld [vmem:[%s971_s28 + $0x30] sm:$0xff] }
  0x21   : > { %v553_v5 = vld [vmem:[%s447_s14] sm:$0xff]  ;;  %628 = vmatpush.msra.mxu1 %v615_v6  ;;  %v613_v8 = vld [vmem:[%s971_s28 + $0x28] sm:$0xff]  ;;  %v611_v11 = vld [vmem:[%s971_s28 + $0x18] sm:$0xff] }
  0x22   : > { %575 = vmatpush.msra.mxu0 %v556_v2  ;;  %v612_v10 = vld [vmem:[%s971_s28 + $0x20] sm:$0xff]  ;;  %v610_v12 = vld [vmem:[%s971_s28 + $0x10] sm:$0xff]  ;;  %v609_v16 = vld [vmem:[%s971_s28 + $0x8] sm:$0xff] }
  0x23   : > { %629 = vmatpush.msra.mxu1 %v614_v7  ;;  %v608_v17 = vld [vmem:[%s971_s28] sm:$0xff] }
  0x24   : > { %576 = vmatpush.msra.mxu0 %v555_v3  ;;  %v607_v31 = vld [vmem:[#allocation2] sm:$0xff] }
  0x25   : > { %630 = vmatpush.msra.mxu1 %v613_v8 }
  0x26   : > { %577 = vmatpush.msra.mxu0 %v554_v4 }
  0x27   : > { %795 = vmatmul.msk.f32.vlgmr.msra.gmra.mxu0 %vm546_vm0, %v553_v5  ;;  %631 = vmatpush.msra.mxu1 %v612_v10 }
  0x29   : > { %632 = vmatpush.msra.mxu1 %v611_v11 }
  0x2b   : > { %633 = vmatpush.msra.mxu1 %v610_v12 }
  0x2d   : > { %634 = vmatpush.msra.mxu1 %v609_v16 }
  0x2f   : > { %635 = vmatpush.msra.mxu1 %v608_v17 }
  0xa4   : > { %v579_v9 = vpop.f32.mrf.mxu0 }
  0xa5   : > { %603 = vrot.lane.b32.xlu0 %v579_v9, %s889_s29  ;;  %v796_v13 = vmul.f32 -1.442695, %v579_v9 }
  0xa7   : > { %831 = vpow2.f32 %v796_v13 }
  0xad   : > { %v832_v14 = vpop.eup %831 }
  0xae   : > { %v585_v15 = vadd.f32 1.0, %v832_v14 }
  0xb0   : > { %833 = vrcp.f32 %v585_v15  ;;  %v597_v23 = vand.u32 2147483648, %v585_v15  ;;  %vm591_vm2 = vweird.f32 %v585_v15  ;;  %v595_v24 = vand.u32 2147483647, %v585_v15 }
  0xb2   : > { %v598_v26 = vor.u32 1.1754944e-38, %v597_v23  ;;  %vm596_vm4 = vcmp.eq.f32.partialorder %v595_v24, 8.507059e+37 }
  0xb6   : > { %v834_v18 = vpop.eup %833 }
  0xb7   : > { %v587_v19 = vmul.f32 %v834_v18, %v585_v15  ;;  %vm592_vm1 = vweird.f32 %v834_v18 }
  0xb8   : > { %vm593_vm3 = vmor %vm591_vm2, %vm592_vm1 }
  0xb9   : > { %v588_v20 = vsub.f32 1.0, %v587_v19 }
  0xbb   : > { %v589_v21 = vmul.f32 %v834_v18, %v588_v20 }
  0xbd   : > { %v590_v22 = vadd.f32 %v834_v18, %v589_v21 }
  0xbf   : > { %v594_v25 = vsel %vm593_vm3, %v834_v18, %v590_v22 }
  0xc0   : > { %v599_v27 = vsel %vm596_vm4, %v598_v26, %v594_v25 }
  0xc1   : > { %v601_v28 = vmul.f32 %v599_v27, %v579_v9 }
 0x117   : > { %v604_v29 = vpop.permute.xlu0 %603 }
 0x118   : > { %v606_v30 = vmul.f32 %v604_v29, %v601_v28 }
 0x11a   : > { %797 = vmatmul.msk.f32.vlgmr.msra.gmra.mxu1 %vm616_vm5, %v606_v30 }
 0x197   : > { %v637_v32 = vpop.f32.mrf.mxu1 }
 0x198   : > { %v640_v33 = vadd.f32 %v637_v32, %v607_v31 }
 0x19a   : > { %641 = vst.msk [vmem:[#allocation2] sm:$0xff] %vm546_vm0, %v640_v33 }
 0x19b PF: > { %v646_v34 = vld [vmem:[%s537_s17] sm:$0xff]  ;;  %v890_v35 = vmov 0  }
 0x19c   : > { %835 = vset.pattern.permute.xlu0 %v890_v35 }
 0x19d   : > { %649 = vperm.xlu0 %835, %v646_v34  }
 0x1a1   : > { %v645_v36 = vld [vmem:[#allocation2] sm:$0xff] }
 0x20f   : > { %v650_v37 = vpop.permute.xlu0 %649 }
 0x210   : > { %v652_v38 = vmul.f32 %v650_v37, %v645_v36 }
 0x212   : > { %654 = vst.msk [vmem:[%s541_s20] sm:$0xff] %vm546_vm0, %v652_v38 }
 0x213 PF: > { %s29_s7 = sadd.s32 1, %s884_s7   ;;  %s1010_s29 = smov %s880_s30 }
 0x214   : > { %p26_p8 = scmp.ge.s32.totalorder %s29_s7, 10   ;;  %s1011_s30 = smov %s1013_s0 }
 0x216   :  { %28 = sbr.rel (!%p26_p8) target bundleno = 9 (0x9), region = 87 }

</bundles_post_ra>
